<compile_context>
chip_gen: v5e
topology: v5e:2x2
jax: 0.10.0
libtpu: 0.0.40
codegen_flags: <defaults>
</compile_context>

<pallas_src>
import jax
import jax.numpy as jnp
from jax.experimental import pallas as pl
from jax.experimental.pallas import tpu as pltpu

EPS = 1e-5


def _conv_stats_kernel(x_ref, w_ref, b_ref, conv_ref, sum_ref, ssq_ref):
    # x_ref:    (1, 4, Ho, Wo, Cin) bf16  stride-2 phase planes of one image:
    #           plane[pr*2+pc][r, c, :] = x[2r+pr, 2c+pc, :]
    # w_ref:    (9*Cin, Cout)       bf16  im2col weights, (dh*3+dw)*Cin+ci major
    # b_ref:    (1, Cout)           f32   conv bias
    # conv_ref: (1, Ho, Wo, Cout)   f32   un-normalized conv output
    # sum_ref:  (1, 1, Cout)        f32   per-image channel sum
    # ssq_ref:  (1, 1, Cout)        f32   per-image channel sum of squares
    _, _, Ho, Wo, Cin = x_ref.shape
    Cout = conv_ref.shape[-1]

    phases = x_ref[0]                                   # (4, Ho, Wo, Cin)
    zero_row = jnp.zeros((1, Wo, Cin), phases.dtype)
    zero_col = jnp.zeros((Ho, 1, Cin), phases.dtype)

    # Tap (dh, dw) needs x[2r+dh-1, 2c+dw-1]:
    #   dh==1 -> even-row plane, index r      ; dh==2 -> odd-row plane, index r
    #   dh==0 -> odd-row plane, index r-1 (zero at r==0: that's the padding row)
    # (same for columns).  Shifts are built with cheap zero-concat; the zero
    # border IS the conv padding, so no padded scratch is needed.
    taps = []
    for dh in range(3):
        pr = 0 if dh == 1 else 1
        for dw in range(3):
            pc = 0 if dw == 1 else 1
            v = phases[pr * 2 + pc]                     # (Ho, Wo, Cin)
            if dh == 0:
                v = jnp.concatenate([zero_row, v[:-1]], axis=0)
            if dw == 0:
                v = jnp.concatenate([zero_col, v[:, :-1]], axis=1)
            taps.append(v)

    # Light im2col: one well-shaped MXU matmul (K = 9*Cin) instead of 9 K=Cin ones.
    col = jnp.concatenate(taps, axis=-1).reshape(Ho * Wo, 9 * Cin)
    acc = jnp.dot(col, w_ref[...], preferred_element_type=jnp.float32)
    acc = acc + b_ref[...]                              # (Ho*Wo, Cout) f32

    conv_ref[...] = acc.reshape(1, Ho, Wo, Cout)        # lane-dense (Cout=128) store
    # Streaming BN statistics (combined across the batch in the wrapper).
    sum_ref[...] = jnp.sum(acc, axis=0, keepdims=True).reshape(1, 1, Cout)
    ssq_ref[...] = jnp.sum(acc * acc, axis=0, keepdims=True).reshape(1, 1, Cout)


def _bn_apply_kernel(y_ref, scale_ref, shift_ref, o_ref):
    # y_ref: (1, Ho, Wo, Cout) f32; scale/shift: (1, Cout) f32
    Cout = o_ref.shape[-1]
    scale = scale_ref[...].reshape(1, 1, 1, Cout)
    shift = shift_ref[...].reshape(1, 1, 1, Cout)
    o_ref[...] = y_ref[...] * scale + shift


def group_embed_forward(x_nchw, w_oihw, conv_bias, gamma, beta):
    """Conv2d(k=3, s=2, p=1) + BatchNorm2d (training-mode batch stats).

    x_nchw: (N, Cin, H, W); w_oihw: (Cout, Cin, 3, 3). Returns (N, Cout, H//2, W//2).
    """
    N, Cin, H, W = x_nchw.shape
    Cout = w_oihw.shape[0]
    assert H % 2 == 0 and W % 2 == 0, "stride-2 kernel assumes even spatial dims"
    Ho, Wo = H // 2, W // 2

    # Layout plumbing (single fused XLA transpose, replaces both the old NHWC
    # transpose AND the old jnp.pad copy): NCHW -> stride-2 phase planes, bf16.
    x_nhwc = jnp.transpose(x_nchw, (0, 2, 3, 1))
    x_ph = (x_nhwc.reshape(N, Ho, 2, Wo, 2, Cin)
            .transpose(0, 2, 4, 1, 3, 5)
            .reshape(N, 4, Ho, Wo, Cin)
            .astype(jnp.bfloat16))

    # OIHW -> im2col weight matrix (9*Cin, Cout), bf16 MXU operands.
    w9 = (jnp.transpose(w_oihw, (2, 3, 1, 0))          # (3, 3, Cin, Cout)
          .reshape(9 * Cin, Cout).astype(jnp.bfloat16))
    bk = conv_bias.reshape(1, Cout).astype(jnp.float32)

    cparams = pltpu.CompilerParams(
        dimension_semantics=("parallel",),             # v7x: 2 TCs split the batch
        vmem_limit_bytes=32 * 1024 * 1024)             # headroom vs v7x 64 MiB VMEM

    conv_out, psum, pssq = pl.pallas_call(
        _conv_stats_kernel,
        out_shape=(
            jax.ShapeDtypeStruct((N, Ho, Wo, Cout), jnp.float32),
            jax.ShapeDtypeStruct((N, 1, Cout), jnp.float32),
            jax.ShapeDtypeStruct((N, 1, Cout), jnp.float32),
        ),
        grid=(N,),
        in_specs=[
            pl.BlockSpec((1, 4, Ho, Wo, Cin), lambda n: (n, 0, 0, 0, 0)),
            pl.BlockSpec((9 * Cin, Cout), lambda n: (0, 0)),
            pl.BlockSpec((1, Cout), lambda n: (0, 0)),
        ],
        out_specs=(
            pl.BlockSpec((1, Ho, Wo, Cout), lambda n: (n, 0, 0, 0)),
            pl.BlockSpec((1, 1, Cout), lambda n: (n, 0, 0)),
            pl.BlockSpec((1, 1, Cout), lambda n: (n, 0, 0)),
        ),
        compiler_params=cparams,
    )(x_ph, w9, bk)

    # Combine per-image partial stats: tiny (Cout,) f32 math.
    count = float(N * Ho * Wo)
    mean = jnp.sum(psum, axis=(0, 1)) / count
    var = jnp.sum(pssq, axis=(0, 1)) / count - mean * mean      # biased (PyTorch BN)
    scale = (gamma.astype(jnp.float32) * jax.lax.rsqrt(var + EPS)).reshape(1, Cout)
    shift = beta.astype(jnp.float32).reshape(1, Cout) - mean.reshape(1, Cout) * scale

    out_nhwc = pl.pallas_call(
        _bn_apply_kernel,
        out_shape=jax.ShapeDtypeStruct((N, Ho, Wo, Cout), jnp.float32),
        grid=(N,),
        in_specs=[
            pl.BlockSpec((1, Ho, Wo, Cout), lambda n: (n, 0, 0, 0)),
            pl.BlockSpec((1, Cout), lambda n: (0, 0)),
            pl.BlockSpec((1, Cout), lambda n: (0, 0)),
        ],
        out_specs=pl.BlockSpec((1, Ho, Wo, Cout), lambda n: (n, 0, 0, 0)),
        compiler_params=cparams,
    )(conv_out, scale, shift)

    # NHWC -> NCHW to match PyTorch output layout.
    return jnp.transpose(out_nhwc, (0, 3, 1, 2))


def group_embed_reference(x, w, b, gamma, beta):
    """Pure-JAX reference (NCHW), matching the kernel's bf16-operand / f32-accum conv."""
    y = jax.lax.conv_general_dilated(
        x.astype(jnp.bfloat16), w.astype(jnp.bfloat16),
        window_strides=(2, 2), padding=((1, 1), (1, 1)),
        dimension_numbers=("NCHW", "OIHW", "NCHW"),
        preferred_element_type=jnp.float32)
    y = y + b.reshape(1, -1, 1, 1)
    mean = jnp.mean(y, axis=(0, 2, 3), keepdims=True)
    var = jnp.mean((y - mean) ** 2, axis=(0, 2, 3), keepdims=True)
    yn = (y - mean) * jax.lax.rsqrt(var + EPS)
    return yn * gamma.reshape(1, -1, 1, 1) + beta.reshape(1, -1, 1, 1)


if __name__ == "__main__":
    key = jax.random.PRNGKey(0)
    kx, kw, kb, kg, kbe = jax.random.split(key, 5)

    # Small shapes consistent with GroupEmbed; out_ch=128 keeps the embedding
    # dim lane-dense (the module default 768 is also a multiple of 128).
    N, Cin, H, W, Cout = 2, 4, 16, 16, 128

    x = jax.random.normal(kx, (N, Cin, H, W), jnp.float32)
    w = jax.random.normal(kw, (Cout, Cin, 3, 3), jnp.float32) * 0.2
    b = 0.1 * jax.random.normal(kb, (Cout,), jnp.float32)
    gamma = 1.0 + 0.3 * jax.random.normal(kg, (Cout,), jnp.float32)
    beta = 0.1 * jax.random.normal(kbe, (Cout,), jnp.float32)

    out = group_embed_forward(x, w, b, gamma, beta)
    out = jax.block_until_ready(out)

    ref = group_embed_reference(x, w, b, gamma, beta)
    assert out.shape == (N, Cout, H // 2, W // 2), out.shape
    max_err = float(jnp.max(jnp.abs(out - ref)))
    assert jnp.allclose(out, ref, atol=2e-3, rtol=2e-3), max_err

    print("KERNEL_OK")
</pallas_src>

<mosaic_0001>
module attributes {stable_mosaic.version = 11 : i64} {
  func.func @_conv_stats_kernel(%arg0: i32, %arg1: memref<1x4x8x8x4xbf16, #tpu.memory_space<vmem>>, %arg2: memref<36x128xbf16, #tpu.memory_space<vmem>>, %arg3: memref<1x128xf32, #tpu.memory_space<vmem>>, %arg4: memref<1x8x8x128xf32, #tpu.memory_space<vmem>>, %arg5: memref<1x1x128xf32, #tpu.memory_space<vmem>>, %arg6: memref<1x1x128xf32, #tpu.memory_space<vmem>>) attributes {dimension_semantics = [#tpu.dimension_semantics<parallel>], iteration_bounds = array<i64: 2>, scalar_prefetch = 0 : i64, scratch_operands = 0 : i64, tpu.core_type = #tpu.core_type<tc>, window_params = [{transform_indices = @transform_0, window_bounds = array<i64: 1, 4, 8, 8, 4>}, {pipeline_mode = #tpu.pipeline_mode<synchronous>, transform_indices = @transform_1, window_bounds = array<i64: 36, 128>}, {pipeline_mode = #tpu.pipeline_mode<synchronous>, transform_indices = @transform_2, window_bounds = array<i64: 1, 128>}, {transform_indices = @transform_3, window_bounds = array<i64: 1, 8, 8, 128>}, {transform_indices = @transform_4, window_bounds = array<i64: 1, 1, 128>}, {transform_indices = @transform_5, window_bounds = array<i64: 1, 1, 128>}]} {
    %c0 = arith.constant 0 : index
    %c0_0 = arith.constant 0 : index
    %c0_1 = arith.constant 0 : index
    %c0_2 = arith.constant 0 : index
    %c0_3 = arith.constant 0 : index
    %0 = vector.load %arg1[%c0, %c0_0, %c0_1, %c0_2, %c0_3] : memref<1x4x8x8x4xbf16, #tpu.memory_space<vmem>>, vector<1x4x8x8x4xbf16>
    %1 = vector.shape_cast %0 : vector<1x4x8x8x4xbf16> to vector<4x8x8x4xbf16>
    %cst = arith.constant 0.000000e+00 : bf16
    %2 = vector.broadcast %cst : bf16 to vector<1x8x4xbf16>
    %cst_4 = arith.constant 0.000000e+00 : bf16
    %3 = vector.broadcast %cst_4 : bf16 to vector<8x1x4xbf16>
    %4 = vector.extract_strided_slice %1 {offsets = [3, 0, 0, 0], sizes = [1, 8, 8, 4], strides = [1, 1, 1, 1]} : vector<4x8x8x4xbf16> to vector<1x8x8x4xbf16>
    %5 = vector.shape_cast %4 : vector<1x8x8x4xbf16> to vector<8x8x4xbf16>
    %6 = vector.extract_strided_slice %5 {offsets = [0, 0, 0], sizes = [7, 8, 4], strides = [1, 1, 1]} : vector<8x8x4xbf16> to vector<7x8x4xbf16>
    %7 = tpu.concatenate %2, %6 in 0 : vector<1x8x4xbf16>, vector<7x8x4xbf16> -> vector<8x8x4xbf16>
    %8 = vector.extract_strided_slice %7 {offsets = [0, 0, 0], sizes = [8, 7, 4], strides = [1, 1, 1]} : vector<8x8x4xbf16> to vector<8x7x4xbf16>
    %9 = tpu.concatenate %3, %8 in 1 : vector<8x1x4xbf16>, vector<8x7x4xbf16> -> vector<8x8x4xbf16>
    %10 = vector.extract_strided_slice %1 {offsets = [2, 0, 0, 0], sizes = [1, 8, 8, 4], strides = [1, 1, 1, 1]} : vector<4x8x8x4xbf16> to vector<1x8x8x4xbf16>
    %11 = vector.shape_cast %10 : vector<1x8x8x4xbf16> to vector<8x8x4xbf16>
    %12 = vector.extract_strided_slice %11 {offsets = [0, 0, 0], sizes = [7, 8, 4], strides = [1, 1, 1]} : vector<8x8x4xbf16> to vector<7x8x4xbf16>
    %13 = tpu.concatenate %2, %12 in 0 : vector<1x8x4xbf16>, vector<7x8x4xbf16> -> vector<8x8x4xbf16>
    %14 = vector.extract_strided_slice %1 {offsets = [3, 0, 0, 0], sizes = [1, 8, 8, 4], strides = [1, 1, 1, 1]} : vector<4x8x8x4xbf16> to vector<1x8x8x4xbf16>
    %15 = vector.shape_cast %14 : vector<1x8x8x4xbf16> to vector<8x8x4xbf16>
    %16 = vector.extract_strided_slice %15 {offsets = [0, 0, 0], sizes = [7, 8, 4], strides = [1, 1, 1]} : vector<8x8x4xbf16> to vector<7x8x4xbf16>
    %17 = tpu.concatenate %2, %16 in 0 : vector<1x8x4xbf16>, vector<7x8x4xbf16> -> vector<8x8x4xbf16>
    %18 = vector.extract_strided_slice %1 {offsets = [1, 0, 0, 0], sizes = [1, 8, 8, 4], strides = [1, 1, 1, 1]} : vector<4x8x8x4xbf16> to vector<1x8x8x4xbf16>
    %19 = vector.shape_cast %18 : vector<1x8x8x4xbf16> to vector<8x8x4xbf16>
    %20 = vector.extract_strided_slice %19 {offsets = [0, 0, 0], sizes = [8, 7, 4], strides = [1, 1, 1]} : vector<8x8x4xbf16> to vector<8x7x4xbf16>
    %21 = tpu.concatenate %3, %20 in 1 : vector<8x1x4xbf16>, vector<8x7x4xbf16> -> vector<8x8x4xbf16>
    %22 = vector.extract_strided_slice %1 {offsets = [0, 0, 0, 0], sizes = [1, 8, 8, 4], strides = [1, 1, 1, 1]} : vector<4x8x8x4xbf16> to vector<1x8x8x4xbf16>
    %23 = vector.shape_cast %22 : vector<1x8x8x4xbf16> to vector<8x8x4xbf16>
    %24 = vector.extract_strided_slice %1 {offsets = [1, 0, 0, 0], sizes = [1, 8, 8, 4], strides = [1, 1, 1, 1]} : vector<4x8x8x4xbf16> to vector<1x8x8x4xbf16>
    %25 = vector.shape_cast %24 : vector<1x8x8x4xbf16> to vector<8x8x4xbf16>
    %26 = vector.extract_strided_slice %1 {offsets = [3, 0, 0, 0], sizes = [1, 8, 8, 4], strides = [1, 1, 1, 1]} : vector<4x8x8x4xbf16> to vector<1x8x8x4xbf16>
    %27 = vector.shape_cast %26 : vector<1x8x8x4xbf16> to vector<8x8x4xbf16>
    %28 = vector.extract_strided_slice %27 {offsets = [0, 0, 0], sizes = [8, 7, 4], strides = [1, 1, 1]} : vector<8x8x4xbf16> to vector<8x7x4xbf16>
    %29 = tpu.concatenate %3, %28 in 1 : vector<8x1x4xbf16>, vector<8x7x4xbf16> -> vector<8x8x4xbf16>
    %30 = vector.extract_strided_slice %1 {offsets = [2, 0, 0, 0], sizes = [1, 8, 8, 4], strides = [1, 1, 1, 1]} : vector<4x8x8x4xbf16> to vector<1x8x8x4xbf16>
    %31 = vector.shape_cast %30 : vector<1x8x8x4xbf16> to vector<8x8x4xbf16>
    %32 = vector.extract_strided_slice %1 {offsets = [3, 0, 0, 0], sizes = [1, 8, 8, 4], strides = [1, 1, 1, 1]} : vector<4x8x8x4xbf16> to vector<1x8x8x4xbf16>
    %33 = vector.shape_cast %32 : vector<1x8x8x4xbf16> to vector<8x8x4xbf16>
    %34 = tpu.concatenate %9, %13, %17, %21, %23, %25, %29, %31, %33 in 2 : vector<8x8x4xbf16>, vector<8x8x4xbf16>, vector<8x8x4xbf16>, vector<8x8x4xbf16>, vector<8x8x4xbf16>, vector<8x8x4xbf16>, vector<8x8x4xbf16>, vector<8x8x4xbf16>, vector<8x8x4xbf16> -> vector<8x8x36xbf16>
    %35 = vector.shape_cast %34 : vector<8x8x36xbf16> to vector<64x36xbf16>
    %c0_5 = arith.constant 0 : index
    %c0_6 = arith.constant 0 : index
    %36 = vector.load %arg2[%c0_5, %c0_6] : memref<36x128xbf16, #tpu.memory_space<vmem>>, vector<36x128xbf16>
    %cst_7 = arith.constant dense<0.000000e+00> : vector<64x128xf32>
    %37 = tpu.matmul %35, %36, %cst_7 {dimension_numbers = #tpu.dot_dimension_numbers<[1], [0], [0], [1], [0, 0, 1, 1], [], []>} : vector<64x36xbf16>, vector<36x128xbf16>, vector<64x128xf32> -> vector<64x128xf32>
    %c0_8 = arith.constant 0 : index
    %c0_9 = arith.constant 0 : index
    %38 = vector.load %arg3[%c0_8, %c0_9] : memref<1x128xf32, #tpu.memory_space<vmem>>, vector<1x128xf32>
    %39 = vector.broadcast %38 : vector<1x128xf32> to vector<64x128xf32>
    %40 = arith.addf %37, %39 : vector<64x128xf32>
    %41 = vector.shape_cast %40 : vector<64x128xf32> to vector<1x8x8x128xf32>
    %c0_10 = arith.constant 0 : index
    %c0_11 = arith.constant 0 : index
    %c0_12 = arith.constant 0 : index
    %c0_13 = arith.constant 0 : index
    %42 = vector.load %arg4[%c0_10, %c0_11, %c0_12, %c0_13] : memref<1x8x8x128xf32, #tpu.memory_space<vmem>>, vector<1x8x8x128xf32>
    tpu.vector_store %arg4[%c0_10, %c0_11, %c0_12, %c0_13], %41 {strides = array<i32>} : memref<1x8x8x128xf32, #tpu.memory_space<vmem>>, vector<1x8x8x128xf32>,
    %cst_14 = arith.constant dense<0.000000e+00> : vector<128xf32>
    %43 = vector.multi_reduction <add>, %40, %cst_14 [0] : vector<64x128xf32> to vector<128xf32>
    %44 = vector.shape_cast %43 : vector<128xf32> to vector<1x128xf32>
    %45 = vector.shape_cast %44 : vector<1x128xf32> to vector<1x1x128xf32>
    %c0_15 = arith.constant 0 : index
    %c0_16 = arith.constant 0 : index
    %c0_17 = arith.constant 0 : index
    %46 = vector.load %arg5[%c0_15, %c0_16, %c0_17] : memref<1x1x128xf32, #tpu.memory_space<vmem>>, vector<1x1x128xf32>
    tpu.vector_store %arg5[%c0_15, %c0_16, %c0_17], %45 {strides = array<i32>} : memref<1x1x128xf32, #tpu.memory_space<vmem>>, vector<1x1x128xf32>,
    %47 = arith.mulf %40, %40 : vector<64x128xf32>
    %cst_18 = arith.constant dense<0.000000e+00> : vector<128xf32>
    %48 = vector.multi_reduction <add>, %47, %cst_18 [0] : vector<64x128xf32> to vector<128xf32>
    %49 = vector.shape_cast %48 : vector<128xf32> to vector<1x128xf32>
    %50 = vector.shape_cast %49 : vector<1x128xf32> to vector<1x1x128xf32>
    %c0_19 = arith.constant 0 : index
    %c0_20 = arith.constant 0 : index
    %c0_21 = arith.constant 0 : index
    %51 = vector.load %arg6[%c0_19, %c0_20, %c0_21] : memref<1x1x128xf32, #tpu.memory_space<vmem>>, vector<1x1x128xf32>
    tpu.vector_store %arg6[%c0_19, %c0_20, %c0_21], %50 {strides = array<i32>} : memref<1x1x128xf32, #tpu.memory_space<vmem>>, vector<1x1x128xf32>,
    return
  }
  func.func @transform_0(%arg0: i32) -> (i32, i32, i32, i32, i32) {
    %c0_i32 = arith.constant 0 : i32
    %c0_i32_0 = arith.constant 0 : i32
    %c0_i32_1 = arith.constant 0 : i32
    %c0_i32_2 = arith.constant 0 : i32
    %c0_i32_3 = arith.constant 0 : i32
    return %arg0, %c0_i32, %c0_i32_0, %c0_i32_1, %c0_i32_2 : i32, i32, i32, i32, i32
  }
  func.func @transform_1(%arg0: i32) -> (i32, i32) {
    %c0_i32 = arith.constant 0 : i32
    %c0_i32_0 = arith.constant 0 : i32
    %c0_i32_1 = arith.constant 0 : i32
    return %c0_i32, %c0_i32_0 : i32, i32
  }
  func.func @transform_2(%arg0: i32) -> (i32, i32) {
    %c0_i32 = arith.constant 0 : i32
    %c0_i32_0 = arith.constant 0 : i32
    %c0_i32_1 = arith.constant 0 : i32
    return %c0_i32, %c0_i32_0 : i32, i32
  }
  func.func @transform_3(%arg0: i32) -> (i32, i32, i32, i32) {
    %c0_i32 = arith.constant 0 : i32
    %c0_i32_0 = arith.constant 0 : i32
    %c0_i32_1 = arith.constant 0 : i32
    %c0_i32_2 = arith.constant 0 : i32
    return %arg0, %c0_i32, %c0_i32_0, %c0_i32_1 : i32, i32, i32, i32
  }
  func.func @transform_4(%arg0: i32) -> (i32, i32, i32) {
    %c0_i32 = arith.constant 0 : i32
    %c0_i32_0 = arith.constant 0 : i32
    %c0_i32_1 = arith.constant 0 : i32
    return %arg0, %c0_i32, %c0_i32_0 : i32, i32, i32
  }
  func.func @transform_5(%arg0: i32) -> (i32, i32, i32) {
    %c0_i32 = arith.constant 0 : i32
    %c0_i32_0 = arith.constant 0 : i32
    %c0_i32_1 = arith.constant 0 : i32
    return %arg0, %c0_i32, %c0_i32_0 : i32, i32, i32
  }
}

</mosaic_0001>

<bundles_post_ra>
// kernel: tpu_custom_call.1
= control target key start
LH: loop header
LB: loop body
LE: loop exit
PB: predicated region body
PF: predicated region fallthrough
CT: control target
= control target key end

     0   :  { %11 = vsyncpa [#allocation3], 0  ;;  %s2033_s0 = inlined_call_operand.vmem [shape: bf16[2,4,8,8,4], index: 0, kind: input, shape index: {}]   ;;  %s2034_s1 = inlined_call_operand.vmem [shape: bf16[36,128], index: 1, kind: input, shape index: {}]   ;;  %s2035_s2 = inlined_call_operand.vmem [shape: f32[1,128], index: 2, kind: input, shape index: {}]   ;;  %s2036_s3 = inlined_call_operand.hbm [shape: f32[2,8,8,128], index: 3, kind: output, shape index: {0}]   ;;  %s2037_s4 = inlined_call_operand.hbm [shape: f32[2,1,128], index: 4, kind: output, shape index: {1}]   ;;  %s2038_s5 = inlined_call_operand.hbm [shape: f32[2,1,128], index: 5, kind: output, shape index: {2}]  }
   0x1   :  { %13 = vsyncpa [#allocation3 + $0x1], 0 }
   0x2   :  { %14 = vsyncpa [#allocation5], 0 }
   0x3   :  { %16 = vsyncpa [#allocation5 + $0x1], 0  ;;  %s1475_s18 = smov 0   ;;  %s1477_s19 = smov 0  }
   0x4   :  { %s1479_s20 = smov 0   ;;  %s1481_s21 = smov 0  }
   0x5 LB: > { %s1496_s22 = sadd.s32 4294967295, %s1433_s21   ;;  %s1175_s23 = sadd.s32 4294967294, %s1433_s21   ;;  %s1433_s21 = sphi %s1481_s21, %s2046_s21   ;;  %s1429_s20 = sphi %s1479_s20, %s2045_s20   ;;  %s1425_s19 = sphi %s1477_s19, %s2044_s19   ;;  %s1421_s18 = sphi %s1475_s18, %s2043_s18  }
   0x6   : > { %s1500_s24 = sadd.s32 1, %s1433_s21   ;;  %s97_s25 = sadd.s32 1, %s1429_s20 }
   0x7   : > { %s94_s26 = ssub.s32 %s1433_s21, %s1500_s24  ;;  %p107_p0 = scmp.ne.s32.totalorder %s1429_s20, %s1425_s19 }
   0x8   : > { %p95_p1 = scmp.eq.s32.totalorder %s94_s26, 0  ;;  %p108_p2 = scmp.eq.s32.totalorder %s1496_s22, 1 }
   0x9   : > { %p113_p3 = scmp.ne.s32.totalorder %s1425_s19, %s1421_s18  ;;  %p114_p4 = scmp.eq.s32.totalorder %s1175_s23, 1 }
   0xa   : > { %s1513_s27 = scalar_select %p95_p1, %s1429_s20, %s97_s25  }
   0xb   : > { %p1515_p5 = por %p108_p2, %p107_p0  ;;  %p1519_p6 = por %p114_p4, %p113_p3 }
   0xc   : > { %p1178_p7 = scmp.ge.s32.totalorder %s1433_s21, 1  ;;  %p198_p8 = scmp.lt.s32.totalorder %s1433_s21, 3 }
   0xe   : > { %p199_p9 = pnand %p1178_p7, %p198_p8 }
   0xf   : > { %s1436_s30 = smov (!%p199_p9), 8   ;;  %s1437_s6 = smov (!%p199_p9), 4  }
  0x10   : > { %202 = sbr.rel (%p199_p9) target bundleno = 485 (0x1e5), region = 32  ;;  %p234_p10 = scmp.lt.s32.totalorder (!%p199_p9), %s1496_s22, 1 }
  0x11   : > { %s1438_s12 = smov (!%p199_p9), 12   ;;  %s1439_s13 = smov (!%p199_p9), 16  }
  0x12   : > { %s1440_s14 = smov (!%p199_p9), 20   ;;  %s1441_s15 = smov (!%p199_p9), 24  }
  0x13   : > { %s1442_s16 = smov (!%p199_p9), 28   ;;  %s1443_s17 = smov (!%p199_p9), 32  }
  0x14   : > { %s1932_s10 = sand.u32 (!%p199_p9), 1, %s1425_s19  }
  0x15   : > { %v1435_v0 = vmov 0   ;;  %s235_s7 = scalar_select %p234_p10, %s1496_s22, 1  ;;  %vm336_vm0 = vcmask 1040384   ;;  %vm337_vm1 = vsmask.f32 256  ;;  %vm732_vm3 = vcmask 31744  }
  0x16   : > { %563 = vrot.lane.b32.xlu1 %v1435_v0, %s1436_s30  ;;  %547 = vrot.lane.b32.xlu0 %v1435_v0, %s1437_s6  ;;  %vm1558_vm2 = vmand %vm336_vm0, %vm337_vm1  ;;  %vm757_vm4 = vcmask 64512   ;;  %vm774_vm5 = vcmask 97280   ;;  %vm791_vm6 = vcmask 130048   ;;  %vm933_vm7 = vcmask 1041408   ;;  %v1201_v17 = vld [vmem:[%s2034_s1 + $0x8] sm:$0xff] }
  0x17   : > { %s1199_s8 = sshll.u32 %s235_s7, 7  ;;  %vm808_vm8 = vcmask 162816   ;;  %vm842_vm9 = vcmask 228352   ;;  %vm825_vm10 = vcmask 195584   ;;  %vm859_vm11 = vcmask 261120   ;;  %s1011_s7 = scalar_lea.sflag [#allocation3], %s1932_s10 }
  0x18   : > { %s1534_s11 = scalar_lea.vmem %s2033_s0, %s1199_s8  ;;  %vm920_vm12 = vcmask 293888  }
  0x19   : > { %v1537_v1 = vld [vmem:[%s1534_s11 + $0x4c] sm:$0xf]  ;;  %v1540_v2 = vld [vmem:[%s1534_s11 + $0x60] sm:$0xf]  ;;  %v1553_v9 = vld [vmem:[%s1534_s11 + $0x50] sm:$0xf] }
  0x1a   : > { %v1543_v3 = vld [vmem:[%s1534_s11 + $0x40] sm:$0xf]  ;;  %555 = vrot.lane.b32.xlu2 %v1537_v1, %s1437_s6  ;;  %v1240_v14 = vld [vmem:[%s1534_s11 + $0x30] sm:$0xff]   ;;  %v1570_v25 = vld [vmem:[%s1534_s11 + $0x6c] sm:$0xf]  ;;  %v451_v42 = vunpack.c.l.b16 %v1540_v2 }
  0x1b   : > { %v1238_v4 = vld [vmem:[%s1534_s11 + $0x20] sm:$0xff]   ;;  %v1229_v21 = vunpack.c.l.b16 %v1240_v14  ;;  %v1230_v27 = vunpack.c.h.b16 %v1240_v14  ;;  %v1577_v30 = vld [vmem:[%s1534_s11 + $0x70] sm:$0xf]  ;;  %v1592_v38 = vld [vmem:[%s1534_s11 + $0x48] sm:$0xf] }
  0x1c   : > { %v1222_v5 = vunpack.c.h.b16 %v1238_v4  ;;  %v1221_v6 = vunpack.c.l.b16 %v1238_v4  ;;  %v1204_v20 = vld [vmem:[%s1534_s11] sm:$0xff]   ;;  %v1602_v45 = vpack.c.b16 %v451_v42, %v451_v42  ;;  %v1236_v51 = vld [vmem:[%s1534_s11 + $0x10] sm:$0xff]   ;;  %v1239_v52 = vld [vmem:[%s1534_s11 + $0x28] sm:$0xff]  }
  0x1d   : > { %v1205_v24 = vunpack.c.l.b16 %v1204_v20  ;;  %v1572_v26 = vpack.c.b16 %v1229_v21, %v1229_v21  ;;  %v1206_v29 = vunpack.c.h.b16 %v1204_v20  ;;  %v1580_v32 = vpack.c.b16 %v1230_v27, %v1230_v27  ;;  %v1589_v37 = vld [vmem:[%s1534_s11 + $0x44] sm:$0xf]  ;;  %v1621_v56 = vld [vmem:[%s1534_s11 + $0x68] sm:$0xf]  ;;  %v1661_v27 = vld [vmem:[%s1534_s11 + $0x74] sm:$0xf] }
  0x1e   : > { %565 = vrot.lane.b32.xlu1 %v1540_v2, %s1436_s30  ;;  %549 = vrot.lane.b32.xlu0 %v1543_v3, %s1437_s6  ;;  %v364_v7 = vpack.c.b16 %v1222_v5, %v1222_v5  ;;  %v363_v8 = vpack.c.b16 %v1221_v6, %v1221_v6  ;;  %v1606_v46 = vld [vmem:[%s1534_s11 + $0x64] sm:$0xf]  ;;  %v468_v49 = vshrl.u32 %v1602_v45, 16  ;;  %v1213_v53 = vunpack.c.l.b16 %v1236_v51 }
  0x1f   : > { %v619_v28 = vpack.c.b16 %v1205_v24, %v1205_v24  ;;  %v400_v31 = vshrl.u32 %v1572_v26, 16  ;;  %v620_v33 = vpack.c.b16 %v1206_v29, %v1206_v29  ;;  %v403_v35 = vshll.u32 %v1572_v26, 16 }
  0x20   : > { %v379_v10 = vshrl.u32 %v364_v7, 16  ;;  %v382_v11 = vshll.u32 %v364_v7, 16  ;;  %v372_v12 = vshrl.u32 %v363_v8, 16  ;;  %v375_v13 = vshll.u32 %v363_v8, 16 }
  0x21   : > { %v402_v34 = vrot.slane %v400_v31, 7  ;;  %v407_v36 = vshrl.u32 %v1580_v32, 16  ;;  %v410_v41 = vshll.u32 %v1580_v32, 16  ;;  %v452_v48 = vunpack.c.l.b16 %v1606_v46 }
  0x22   : > { %v381_v15 = vrot.slane %v379_v10, 7  ;;  %v374_v16 = vrot.slane %v372_v12, 7  ;;  %557 = vrot.lane.b32.xlu2 %v1553_v9, %s1437_s6  ;;  %v470_v54 = vrot.slane %v468_v49, 7  ;;  %v471_v55 = vshll.u32 %v1602_v45, 16 }
  0x23   : > { %v405_v39 = vor.u32 %v403_v35, %v402_v34  ;;  %v409_v40 = vrot.slane %v407_v36, 7  ;;  %v1614_v50 = vpack.c.b16 %v452_v48, %v452_v48  ;;  %v1225_v58 = vunpack.c.l.b16 %v1239_v52 }
  0x24   : > { %v384_v18 = vor.u32 %v382_v11, %v381_v15  ;;  %v377_v19 = vor.u32 %v375_v13, %v374_v16  ;;  %v623_v59 = vpack.c.b16 %v1213_v53, %v1213_v53  ;;  %v1214_v60 = vunpack.c.h.b16 %v1236_v51  ;;  %v1645_v16 = vld [vmem:[%s1534_s11 + $0x54] sm:$0xf] }
  0x25   : > { %v439_v43 = vsel %vm1558_vm2, 0, %v405_v39  ;;  %v412_v44 = vor.u32 %v410_v41, %v409_v40  ;;  %v475_v57 = vshrl.u32 %v1614_v50, 16  ;;  %v473_v61 = vor.u32 %v471_v55, %v470_v54  ;;  %v1235_v39 = vld [vmem:[%s1534_s11 + $0x8] sm:$0xff]   ;;  %v1241_v40 = vld [vmem:[%s1534_s11 + $0x38] sm:$0xff]  }
  0x26   : > { %v436_v22 = vsel %vm1558_vm2, 0, %v384_v18  ;;  %v435_v23 = vsel %vm1558_vm2, 0, %v377_v19  ;;  %v478_v63 = vshll.u32 %v1614_v50, 16  ;;  %v1629_v4 = vpack.c.b16 %v1225_v58, %v1225_v58  ;;  %v1648_v18 = vld [vmem:[%s1534_s11 + $0x58] sm:$0xf] }
  0x27   : > { %589 = vrot.lane.b32.xlu1 %v436_v22, %s1438_s12  ;;  %587 = vrot.lane.b32.xlu0 %v435_v23, %s1438_s12  ;;  %v440_v47 = vsel %vm1558_vm2, 0, %v412_v44  ;;  %v477_v62 = vrot.slane %v475_v57, 7  ;;  %v1226_v5 = vunpack.c.h.b16 %v1239_v52  ;;  %v624_v6 = vpack.c.b16 %v1214_v60, %v1214_v60  ;;  %v1688_v52 = vld [vmem:[%s1534_s11 + $0x78] sm:$0xf] }
  0x28   : > { %v386_v10 = vshrl.u32 %v1629_v4, 16  ;;  %v389_v14 = vshll.u32 %v1629_v4, 16  ;;  %v455_v29 = vunpack.c.l.b16 %v1577_v30  ;;  %v685_v31 = vunpack.c.l.b16 %v1589_v37 }
  0x29   : > { %v1635_v11 = vpack.c.b16 %v1226_v5, %v1226_v5  ;;  %v301_v41 = vshrl.u32 %v1570_v25, 16  ;;  %v1234_v57 = vunpack.c.h.b16 %v1241_v40  ;;  %v308_v58 = vshrl.u32 %v1577_v30, 16 }
  0x2a   : > { %571 = vrot.lane.b32.xlu2 %v1570_v25, %s1436_s30  ;;  %v388_v13 = vrot.slane %v386_v10, 7  ;;  %v1670_v35 = vpack.c.b16 %v455_v29, %v455_v29  ;;  %v693_v36 = vpack.c.b16 %v685_v31, %v685_v31 }
  0x2b   : > { %v393_v15 = vshrl.u32 %v1635_v11, 16  ;;  %v396_v21 = vshll.u32 %v1635_v11, 16  ;;  %v303_v48 = vrot.slane %v301_v41, 7  ;;  %v1698_v5 = vpack.c.b16 %v1234_v57, %v1234_v57 }
  0x2c   : > { %v391_v19 = vor.u32 %v389_v14, %v388_v13  ;;  %v499_v51 = vshll.u32 %v1670_v35, 16  ;;  %v310_v10 = vrot.slane %v308_v58, 7  ;;  %v283_v41 = vshll.u32 %v1540_v2, 16 }
  0x2d   : > { %v395_v20 = vrot.slane %v393_v15, 7  ;;  %v421_v15 = vshrl.u32 %v1698_v5, 16 }
  0x2e   : > { %v437_v22 = vsel %vm1558_vm2, 0, %v391_v19 }
  0x2f   : > { %573 = vrot.lane.b32.xlu0 %v1577_v30, %s1436_s30  ;;  %627 = vrot.lane.b32.xlu1 %v619_v28, %s1439_s13  ;;  %v398_v23 = vor.u32 %v396_v21, %v395_v20  ;;  %v684_v28 = vunpack.c.l.b16 %v1543_v3 }
  0x31   : > { %v438_v24 = vsel %vm1558_vm2, 0, %v398_v23  ;;  %v692_v34 = vpack.c.b16 %v684_v28, %v684_v28  ;;  %v424_v23 = vshll.u32 %v1698_v5, 16 }
  0x32   : > { %629 = vrot.lane.b32.xlu2 %v620_v33, %s1439_s13  ;;  %v456_v33 = vunpack.c.l.b16 %v1661_v27 }
  0x34   : > { %v1675_v3 = vpack.c.b16 %v456_v33, %v456_v33 }
  0x36   : > { %v503_v42 = vshrl.u32 %v1675_v3, 16  ;;  %v506_v54 = vshll.u32 %v1675_v3, 16 }
  0x37   : > { %551 = vrot.lane.b32.xlu0 %v1589_v37, %s1437_s6  ;;  %553 = vrot.lane.b32.xlu1 %v1592_v38, %s1437_s6  ;;  %v1209_v37 = vunpack.c.l.b16 %v1235_v39 }
  0x38   : > { %v505_v53 = vrot.slane %v503_v42, 7 }
  0x39   : > { %v621_v44 = vpack.c.b16 %v1209_v37, %v1209_v37  ;;  %v688_v37 = vunpack.c.l.b16 %v1553_v9 }
  0x3a   : > { %595 = vrot.lane.b32.xlu2 %v439_v43, %s1438_s12  ;;  %v1233_v43 = vunpack.c.l.b16 %v1241_v40 }
  0x3c   : > { %v1691_v55 = vpack.c.b16 %v1233_v43, %v1233_v43 }
  0x3e   : > { %v417_v14 = vshll.u32 %v1691_v55, 16 }
  0x3f   : > { %597 = vrot.lane.b32.xlu0 %v440_v47, %s1438_s12  ;;  %643 = vrot.lane.b32.xlu1 %v363_v8, %s1440_s14  ;;  %v480_v8 = vor.u32 %v478_v63, %v477_v62  ;;  %v1210_v47 = vunpack.c.h.b16 %v1235_v39  ;;  %v508_v62 = vor.u32 %v506_v54, %v505_v53  ;;  %v414_v63 = vshrl.u32 %v1691_v55, 16 }
  0x40   : > { %v453_v39 = vunpack.c.l.b16 %v1621_v56 }
  0x41   : > { %v532_v12 = vsel %vm1558_vm2, 0, %v480_v8  ;;  %v416_v13 = vrot.slane %v414_v63, 7 }
  0x42   : > { %645 = vrot.lane.b32.xlu2 %v364_v7, %s1440_s14  ;;  %v531_v7 = vsel %vm1558_vm2, 0, %v473_v61 }
  0x43   : > { %v419_v21 = vor.u32 %v417_v14, %v416_v13 }
  0x45   : > { %v441_v28 = vsel %vm1558_vm2, 0, %v419_v21  ;;  %v271_v21 = vld [vmem:[%s1534_s11 + $0x7c] sm:$0xf] }
  0x47   : > { %567 = vrot.lane.b32.xlu0 %v1606_v46, %s1436_s30  ;;  %569 = vrot.lane.b32.xlu1 %v1621_v56, %s1436_s30 }
  0x4a   : > { %635 = vrot.lane.b32.xlu2 %v623_v59, %s1439_s13  ;;  %v622_v59 = vpack.c.b16 %v1210_v47, %v1210_v47 }
  0x4f   : > { %637 = vrot.lane.b32.xlu0 %v624_v6, %s1439_s13  ;;  %667 = vrot.lane.b32.xlu1 %v531_v7, %s1441_s15  ;;  %v311_v6 = vshll.u32 %v1577_v30, 16 }
  0x51   : > { %v313_v20 = vor.u32 %v311_v6, %v310_v10 }
  0x52   : > { %669 = vrot.lane.b32.xlu2 %v532_v12, %s1441_s15  ;;  %v536_v12 = vsel %vm1558_vm2, 0, %v508_v62 }
  0x57   : > { %559 = vrot.lane.b32.xlu0 %v1645_v16, %s1437_s6  ;;  %561 = vrot.lane.b32.xlu1 %v1648_v18, %s1437_s6 }
  0x5a   : > { %591 = vrot.lane.b32.xlu2 %v437_v22, %s1438_s12  ;;  %v423_v22 = vrot.slane %v421_v15, 7  ;;  %v457_v15 = vunpack.c.l.b16 %v1688_v52 }
  0x5c   : > { %v426_v29 = vor.u32 %v424_v23, %v423_v22  ;;  %v1771_v23 = vpack.c.b16 %v457_v15, %v457_v15 }
  0x5e   : > { %v442_v40 = vsel %vm1558_vm2, 0, %v426_v29 }
  0x5f   : > { %593 = vrot.lane.b32.xlu0 %v438_v24, %s1438_s12  ;;  %651 = vrot.lane.b32.xlu1 %v1572_v26, %s1440_s14  ;;  %v496_v26 = vshrl.u32 %v1670_v35, 16  ;;  %v344_v24 = vsel %vm1558_vm2, 0, %v313_v20 }
  0x61   : > { %v498_v49 = vrot.slane %v496_v26, 7 }
  0x62   : > { %653 = vrot.lane.b32.xlu2 %v1580_v32, %s1440_s14  ;;  %v304_v32 = vshll.u32 %v1570_v25, 16 }
  0x63   : > { %v501_v61 = vor.u32 %v499_v51, %v498_v49 }
  0x64   : > { %v306_v60 = vor.u32 %v304_v32, %v303_v48  ;;  %v696_v32 = vpack.c.b16 %v688_v37, %v688_v37  ;;  %v510_v37 = vshrl.u32 %v1771_v23, 16 }
  0x65   : > { %v535_v8 = vsel %vm1558_vm2, 0, %v501_v61 }
  0x66   : > { %v343_v7 = vsel %vm1558_vm2, 0, %v306_v60 }
  0x67   : > { %700 = vrot.lane.b32.xlu0 %v692_v34, %s1442_s16  ;;  %702 = vrot.lane.b32.xlu1 %v693_v36, %s1442_s16  ;;  %v280_v34 = vshrl.u32 %v1540_v2, 16  ;;  %v454_v36 = vunpack.c.l.b16 %v1570_v25  ;;  %v1237_v25 = vld [vmem:[%s1534_s11 + $0x18] sm:$0xff]   ;;  %v689_v2 = vunpack.c.l.b16 %v1645_v16 }
  0x68   : > { %v1217_v49 = vunpack.c.l.b16 %v1237_v25 }
  0x69   : > { %v282_v26 = vrot.slane %v280_v34, 7  ;;  %v1735_v42 = vpack.c.b16 %v454_v36, %v454_v36  ;;  %v697_v58 = vpack.c.b16 %v689_v2, %v689_v2  ;;  %v294_v36 = vshrl.u32 %v1621_v56, 16 }
  0x6a   : > { %575 = vrot.lane.b32.xlu2 %v1661_v27, %s1436_s30  ;;  %v625_v16 = vpack.c.b16 %v1217_v49, %v1217_v49 }
  0x6b   : > { %v285_v51 = vor.u32 %v283_v41, %v282_v26  ;;  %v489_v54 = vshrl.u32 %v1735_v42, 16  ;;  %v492_v62 = vshll.u32 %v1735_v42, 16  ;;  %v687_v26 = vunpack.c.l.b16 %v1537_v1 }
  0x6d   : > { %v491_v61 = vrot.slane %v489_v54, 7 }
  0x6f   : > { %577 = vrot.lane.b32.xlu0 %v1688_v52, %s1436_s30  ;;  %631 = vrot.lane.b32.xlu1 %v621_v44, %s1439_s13  ;;  %v494_v13 = vor.u32 %v492_v62, %v491_v61  ;;  %v263_v62 = vld [vmem:[%s1534_s11 + $0x5c] sm:$0xf]  ;;  %s1179_s11 = sshll.u32 %s1932_s10, 6 }
  0x72   : > { %633 = vrot.lane.b32.xlu2 %v622_v59, %s1439_s13  ;;  %v1218_v59 = vunpack.c.h.b16 %v1237_v25  ;;  %v290_v25 = vshll.u32 %v1606_v46, 16 }
  0x74   : > { %v556_v19 = vpop.permute.xlu2 %555  ;;  %v626_v10 = vpack.c.b16 %v1218_v59, %v1218_v59 }
  0x75   : > { %v747_v30 = vsel %vm732_vm3, %v343_v7, %v556_v19 }
  0x77   : > { %675 = vrot.lane.b32.xlu0 %v535_v8, %s1441_s15  ;;  %677 = vrot.lane.b32.xlu1 %v536_v12, %s1441_s15 }
  0x7a   : > { %716 = vrot.lane.b32.xlu2 %v1602_v45, %s1443_s17  ;;  %v275_v45 = vrot.slane %v1435_v0, 7 }
  0x7c   : > { %v558_v31 = vpop.permute.xlu2 %557  ;;  %v339_v0 = vsel %vm1558_vm2, 0, %v275_v45  ;;  %v287_v45 = vshrl.u32 %v1606_v46, 16 }
  0x7d   : > { %v1721_v33 = vsel %vm732_vm3, %v344_v24, %v558_v31  ;;  %v458_v24 = vunpack.c.l.b16 %v271_v21  ;;  %v322_v21 = vshrl.u32 %v1688_v52, 16 }
  0x7f   : > { %718 = vrot.lane.b32.xlu0 %v1614_v50, %s1443_s17  ;;  %599 = vrot.lane.b32.xlu1 %v441_v28, %s1438_s12  ;;  %v1737_v50 = vpack.c.b16 %v453_v39, %v453_v39 }
  0x81   : > { %v482_v53 = vshrl.u32 %v1737_v50, 16 }
  0x82   : > { %601 = vrot.lane.b32.xlu2 %v442_v40, %s1438_s12  ;;  %v1782_v40 = vpack.c.b16 %v458_v24, %v458_v24  ;;  %v318_v24 = vshll.u32 %v1661_v27, 16 }
  0x83   : > { %v484_v60 = vrot.slane %v482_v53, 7 }
  0x84   : > { %v572_v43 = vpop.permute.xlu2 %571 }
  0x85   : > { %v767_v44 = vsel %vm757_vm4, %v747_v30, %v572_v43  ;;  %v534_v30 = vsel %vm1558_vm2, 0, %v494_v13  ;;  %v297_v43 = vshll.u32 %v1621_v56, 16  ;;  %v695_v56 = vpack.c.b16 %v687_v26, %v687_v26 }
  0x87   : > { %647 = vrot.lane.b32.xlu0 %v1629_v4, %s1440_s14  ;;  %649 = vrot.lane.b32.xlu1 %v1635_v11, %s1440_s14  ;;  %v340_v4 = vsel %vm1558_vm2, 0, %v285_v51  ;;  %v485_v11 = vshll.u32 %v1737_v50, 16  ;;  %v520_v51 = vshll.u32 %v1782_v40, 16 }
  0x88   : > { %v564_v47 = vpop.permute.xlu1 %563  ;;  %v548_v9 = vpop.permute.xlu0 %547 }
  0x89   : > { %v735_v48 = vsel %vm732_vm3, %v339_v0, %v548_v9  ;;  %v487_v12 = vor.u32 %v485_v11, %v484_v60  ;;  %v686_v0 = vunpack.c.l.b16 %v1592_v38  ;;  %v513_v9 = vshll.u32 %v1771_v23, 16 }
  0x8a   : > { %v759_v57 = vsel %vm757_vm4, %v735_v48, %v564_v47  ;;  %708 = vrot.lane.b32.xlu2 %v696_v32, %s1442_s16  ;;  %v296_v32 = vrot.slane %v294_v36, 7  ;;  %v512_v47 = vrot.slane %v510_v37, 7 }
  0x8b   : > { %v533_v19 = vsel %vm1558_vm2, 0, %v487_v12 }
  0x8c   : > { %v630_v63 = vpop.permute.xlu2 %629  ;;  %v299_v48 = vor.u32 %v297_v43, %v296_v32  ;;  %v515_v53 = vor.u32 %v513_v9, %v512_v47 }
  0x8f   : > { %710 = vrot.lane.b32.xlu0 %v697_v58, %s1442_s16  ;;  %639 = vrot.lane.b32.xlu1 %v625_v16, %s1439_s13  ;;  %v537_v16 = vsel %vm1558_vm2, 0, %v515_v53 }
  0x90   : > { %v566_v6 = vpop.permute.xlu1 %565  ;;  %v550_v7 = vpop.permute.xlu0 %549 }
  0x91   : > { %v738_v8 = vsel %vm732_vm3, %v340_v4, %v550_v7  ;;  %v691_v7 = vunpack.c.l.b16 %v263_v62 }
  0x92   : > { %v761_v14 = vsel %vm757_vm4, %v738_v8, %v566_v6  ;;  %641 = vrot.lane.b32.xlu2 %v626_v10, %s1439_s13  ;;  %v690_v6 = vunpack.c.l.b16 %v1648_v18  ;;  %s1331_s13 = scalar_lea.hbm %s2036_s3, 128 }
  0x94   : > { %v596_v20 = vpop.permute.xlu2 %595  ;;  %v698_v13 = vpack.c.b16 %v690_v6, %v690_v6 }
  0x95   : > { %v784_v22 = vsel %vm774_vm5, %v767_v44, %v596_v20  ;;  %v517_v44 = vshrl.u32 %v1782_v40, 16  ;;  %v315_v20 = vshrl.u32 %v1661_v27, 16 }
  0x97   : > { %671 = vrot.lane.b32.xlu0 %v533_v19, %s1441_s15  ;;  %673 = vrot.lane.b32.xlu1 %v534_v30, %s1441_s15  ;;  %v519_v49 = vrot.slane %v517_v44, 7 }
  0x99   : > { %v590_v28 = vpop.permute.xlu1 %589  ;;  %v588_v29 = vpop.permute.xlu0 %587  ;;  %v522_v58 = vor.u32 %v520_v51, %v519_v49 }
  0x9a   : > { %v778_v31 = vsel %vm774_vm5, %v761_v14, %v590_v28  ;;  %v776_v34 = vsel %vm774_vm5, %v759_v57, %v588_v29  ;;  %724 = vrot.lane.b32.xlu2 %v1670_v35, %s1443_s17  ;;  %v289_v35 = vrot.slane %v287_v45, 7  ;;  %v699_v14 = vpack.c.b16 %v691_v7, %v691_v7 }
  0x9b   : > { %v1780_v39 = vsel %vm791_vm6, %v778_v31, %v630_v63  ;;  %v538_v61 = vsel %vm1558_vm2, 0, %v522_v58  ;;  %v325_v28 = vshll.u32 %v1688_v52, 16  ;;  %v317_v29 = vrot.slane %v315_v20, 7 }
  0x9c   : > { %v1785_v41 = vpop.permute.xlu2 %645  ;;  %v324_v31 = vrot.slane %v322_v21, 7 }
  0x9d   : > { %v812_v6 = vsel %vm808_vm8, %v1780_v39, %v1785_v41 }
  0x9e   : > { %v327_v37 = vor.u32 %v325_v28, %v324_v31 }
  0x9f   : > { %726 = vrot.lane.b32.xlu0 %v1675_v3, %s1443_s17  ;;  %655 = vrot.lane.b32.xlu1 %v1691_v55, %s1440_s14  ;;  %v694_v3 = vpack.c.b16 %v686_v0, %v686_v0  ;;  %v292_v55 = vor.u32 %v290_v25, %v289_v35  ;;  %v880_v0 = vld [vmem:[%s2034_s1 + $0x10] sm:$0x3] }
  0xa0   : > { %v346_v52 = vsel %vm1558_vm2, 0, %v327_v37 }
  0xa1   : > { %v574_v1 = vpop.permute.xlu0 %573  ;;  %v628_v2 = vpop.permute.xlu1 %627 }
  0xa2   : > { %v769_v38 = vsel %vm757_vm4, %v1721_v33, %v574_v1  ;;  %v1800_v46 = vsel %vm791_vm6, %v776_v34, %v628_v2  ;;  %657 = vrot.lane.b32.xlu2 %v1698_v5, %s1440_s14  ;;  %v341_v33 = vsel %vm1558_vm2, 0, %v292_v55  ;;  %v342_v5 = vsel %vm1558_vm2, 0, %v299_v48  ;;  %s1938_s14 = scalar_lea.vmem [#allocation2], %s1179_s11 }
  0xa3   : > { %s1031_s26 = sshll.u32 %s1938_s14, 4  ;;  %s1032_s26 = int_to_ptr.vmem [resolvable:$true] %s1031_s26 }
  0xa4   : > { %v636_v54 = vpop.permute.xlu2 %635 }
  0xa5   : > { %v1806_v57 = vsel %vm791_vm6, %v784_v22, %v636_v54 }
  0xa7   : > { %704 = vrot.lane.b32.xlu0 %v694_v3, %s1442_s16  ;;  %706 = vrot.lane.b32.xlu1 %v695_v56, %s1442_s16  ;;  %v1200_v3 = vld [vmem:[%s2034_s1] sm:$0xff] }
  0xa9   : > { %v552_v4 = vpop.permute.xlu0 %551  ;;  %v554_v59 = vpop.permute.xlu1 %553 }
  0xaa   : > { %v741_v60 = vsel %vm732_vm3, %v341_v33, %v552_v4  ;;  %v744_v11 = vsel %vm732_vm3, %v342_v5, %v554_v59  ;;  %679 = vrot.lane.b32.xlu2 %v537_v16, %s1441_s15 }
  0xac   : > { %v1822_v63 = vpop.permute.xlu2 %669 }
  0xad   : > { %v829_v7 = vsel %vm825_vm10, %v812_v6, %v1822_v63 }
  0xaf   : > { %681 = vrot.lane.b32.xlu0 %v538_v61, %s1441_s15  ;;  %720 = vrot.lane.b32.xlu1 %v1737_v50, %s1443_s17  ;;  %s1202_s15 = sshll.u32 %s1496_s22, 6 }
  0xb0   : > { %s1030_s25 = scalar_lea.hbm %s2036_s3, %s1202_s15 }
  0xb1   : > { %v598_v8 = vpop.permute.xlu0 %597  ;;  %v1828_v10 = vpop.permute.xlu1 %643  ;;  %s1033_s6 = sshll.u32 %s1030_s25, 4  ;;  %s1034_s6 = int_to_ptr.hbm [resolvable:$true] %s1033_s6 }
  0xb2   : > { %v786_v12 = vsel %vm774_vm5, %v769_v38, %v598_v8  ;;  %722 = vrot.lane.b32.xlu2 %v1735_v42, %s1443_s17  ;;  %v810_v59 = vsel %vm808_vm8, %v1800_v46, %v1828_v10  ;;  %s1325_s8 = sshra.s32 %s1034_s6, 4  ;;  %s1326_s8 = int_to_ptr.hbm [resolvable:$true] %s1325_s8 }
  0xb3   : > { %s1327_s9 = scalar_lea.hbm %s1326_s8, 64  ;;  %p1332_p0 = scmp.lt.s32.totalorder %s1326_s8, %s2036_s3 }
  0xb4   : > { %v592_v15 = vpop.permute.xlu2 %591  ;;  %p1328_p11 = scmp.ne.s32.totalorder %s1326_s8, %s1327_s9  ;;  %p1333_p1 = scmp.lt.s32.totalorder %s1331_s13, %s1327_s9 }
  0xb6   : > { %p1329_p12 = pnand %p1328_p11, %p1515_p5  ;;  %p1334_p2 = por %p1333_p1, %p1332_p0 }
  0xb7   : > { %712 = vrot.lane.b32.xlu0 %v698_v13, %s1442_s16  ;;  %714 = vrot.lane.b32.xlu1 %v699_v14, %s1442_s16 }
  0xb8   : > { %p1330_p13 = pneg %p1329_p12 }
  0xb9   : > { %v568_v18 = vpop.permute.xlu0 %567  ;;  %v570_v19 = vpop.permute.xlu1 %569 }
  0xba   : > { %v763_v50 = vsel %vm757_vm4, %v741_v60, %v568_v18  ;;  %v765_v30 = vsel %vm757_vm4, %v744_v11, %v570_v19  ;;  %728 = vrot.lane.b32.xlu2 %v1771_v23, %s1443_s17  ;;  %v320_v23 = vor.u32 %v318_v24, %v317_v29  ;;  %p1335_p3 = pnand %p1334_p2, %p1330_p13 }
  0xbb   : > { %v1842_v42 = vsel %vm774_vm5, %v763_v50, %v592_v15 }
  0xbc   : > { %v1844_v22 = vpop.permute.xlu2 %653  ;;  %v345_v27 = vsel %vm1558_vm2, 0, %v320_v23 }
  0xbf   : > { %730 = vrot.lane.b32.xlu0 %v1782_v40, %s1443_s17  ;;  %v914_v40 = vunpack.c.l.b16 %v880_v0 }
  0xc1   : > { %v638_v34 = vpop.permute.xlu0 %637  ;;  %v668_v45 = vpop.permute.xlu1 %667  ;;  %v917_v35 = vpack.c.b16 %v914_v40, %v914_v40 }
  0xc2   : > { %v1851_v36 = vsel %vm791_vm6, %v786_v12, %v638_v34  ;;  %v827_v60 = vsel %vm825_vm10, %v810_v59, %v668_v45 }
  0xc3   : > { %v935_v47 = vsel %vm933_vm7, %v917_v35, 0  ;;  %v820_v45 = vsel %vm808_vm8, %v1851_v36, %v1844_v22 }
  0xc4   : > { %v576_v26 = vpop.permute.xlu2 %575  ;;  %942 = vmatpush.bf16.msra.mxu0 %v935_v47  ;;  %1243 = vmatpush.bf16.msra.mxu2 %v935_v47 }
  0xc5   : > { %1242 = vmatpush.bf16.msra.mxu1 %v935_v47  ;;  %1244 = vmatpush.bf16.msra.mxu3 %v935_v47 }
  0xc8   : > { %943 = vmatpush.bf16.msra.mxu0 %v1201_v17  ;;  %1246 = vmatpush.bf16.msra.mxu2 %v1201_v17 }
  0xc9   : > { %v560_v25 = vpop.permute.xlu0 %559  ;;  %v562_v43 = vpop.permute.xlu1 %561  ;;  %1245 = vmatpush.bf16.msra.mxu1 %v1201_v17  ;;  %1247 = vmatpush.bf16.msra.mxu3 %v1201_v17 }
  0xca   : > { %v753_v32 = vsel %vm732_vm3, %v345_v27, %v560_v25  ;;  %v756_v44 = vsel %vm732_vm3, %v346_v52, %v562_v43 }
  0xcb   : > { %v771_v9 = vsel %vm757_vm4, %v753_v32, %v576_v26 }
  0xcc   : > { %v1863_v1 = vpop.permute.xlu2 %633  ;;  %944 = vmatpush.bf16.msra.mxu0 %v1200_v3  ;;  %1249 = vmatpush.bf16.msra.mxu2 %v1200_v3 }
  0xcd   : > { %1248 = vmatpush.bf16.msra.mxu1 %v1200_v3  ;;  %1250 = vmatpush.bf16.msra.mxu3 %v1200_v3 }
  0xd1   : > { %v594_v2 = vpop.permute.xlu0 %593  ;;  %v652_v38 = vpop.permute.xlu1 %651 }
  0xd2   : > { %v1869_v56 = vsel %vm774_vm5, %v765_v30, %v594_v2  ;;  %v818_v31 = vsel %vm808_vm8, %v1806_v57, %v652_v38 }
  0xd3   : > { %v799_v47 = vsel %vm791_vm6, %v1869_v56, %v1863_v1 }
  0xd4   : > { %v717_v55 = vpop.permute.xlu2 %716 }
  0xd9   : > { %v701_v48 = vpop.permute.xlu0 %700  ;;  %v703_v49 = vpop.permute.xlu1 %702 }
  0xda   : > { %v844_v11 = vsel %vm842_vm9, %v827_v60, %v701_v48  ;;  %v846_v12 = vsel %vm842_vm9, %v829_v7, %v703_v49 }
  0xdb   : > { %v861_v8 = vsel %vm859_vm11, %v844_v11, %v717_v55 }
  0xdc   : > { %v602_v51 = vpop.permute.xlu2 %601  ;;  %v893_v15 = vunpack.c.l.b16 %v861_v8 }
  0xe1   : > { %v578_v53 = vpop.permute.xlu0 %577  ;;  %v1874_v54 = vpop.permute.xlu1 %631 }
  0xe2   : > { %v773_v33 = vsel %vm757_vm4, %v756_v44, %v578_v53  ;;  %v797_v3 = vsel %vm791_vm6, %v1842_v42, %v1874_v54 }
  0xe3   : > { %v790_v5 = vsel %vm774_vm5, %v773_v33, %v602_v51 }
  0xe4   : > { %v709_v58 = vpop.permute.xlu2 %708 }
  0xe9   : > { %v676_v16 = vpop.permute.xlu0 %675  ;;  %v678_v4 = vpop.permute.xlu1 %677 }
  0xea   : > { %v835_v34 = vsel %vm825_vm10, %v818_v31, %v676_v16  ;;  %v837_v37 = vsel %vm825_vm10, %v820_v45, %v678_v4 }
  0xeb   : > { %v852_v23 = vsel %vm842_vm9, %v835_v34, %v709_v58 }
  0xec   : > { %v642_v61 = vpop.permute.xlu2 %641 }
  0xed   : > { %v807_v62 = vsel %vm791_vm6, %v790_v5, %v642_v61 }
  0xf1   : > { %v719_v46 = vpop.permute.xlu0 %718  ;;  %v600_v10 = vpop.permute.xlu1 %599 }
  0xf2   : > { %v863_v13 = vsel %vm859_vm11, %v846_v12, %v719_v46  ;;  %v788_v14 = vsel %vm774_vm5, %v771_v9, %v600_v10  ;;  %v1310_v12 = vld [vmem:[%s2035_s2] ss:$0 sm:$0xff] }
  0xf3   : > { %v894_v18 = vunpack.c.l.b16 %v863_v13 }
  0xf4   : > { %v725_v19 = vpop.permute.xlu2 %724 }
  0xf5   : > { %v901_v50 = vpack.c.b16 %v894_v18, %v893_v15  ;;  %v869_v26 = vsel %vm859_vm11, %v852_v23, %v725_v19 }
  0xf6   : > { %v897_v43 = vunpack.c.l.b16 %v869_v26 }
  0xf7   : > { %1190 = vmatmul.msk.bf16.vlgmr.msra.gmra.mxu0 %vm920_vm12, %v901_v50 }
  0xf9   : > { %v648_v39 = vpop.permute.xlu0 %647  ;;  %v650_v41 = vpop.permute.xlu1 %649 }
  0xfa   : > { %v816_v9 = vsel %vm808_vm8, %v799_v47, %v650_v41  ;;  %v814_v55 = vsel %vm808_vm8, %v797_v3, %v648_v39 }
  0xfc   : > { %v658_v63 = vpop.permute.xlu2 %657 }
  0xfd   : > { %v824_v30 = vsel %vm808_vm8, %v807_v62, %v658_v63 }
 0x101   : > { %v711_v20 = vpop.permute.xlu0 %710  ;;  %v640_v21 = vpop.permute.xlu1 %639 }
 0x102   : > { %v805_v24 = vsel %vm791_vm6, %v788_v14, %v640_v21  ;;  %v854_v27 = vsel %vm842_vm9, %v837_v37, %v711_v20 }
 0x104   : > { %v680_v0 = vpop.permute.xlu2 %679 }
 0x109   : > { %v672_v28 = vpop.permute.xlu0 %671  ;;  %v674_v29 = vpop.permute.xlu1 %673 }
 0x10a   : > { %v833_v17 = vsel %vm825_vm10, %v816_v9, %v674_v29  ;;  %v831_v48 = vsel %vm825_vm10, %v814_v55, %v672_v28 }
 0x10c   : > { %v723_v38 = vpop.permute.xlu2 %722 }
 0x111   : > { %v727_v52 = vpop.permute.xlu0 %726  ;;  %v656_v40 = vpop.permute.xlu1 %655 }
 0x112   : > { %v871_v25 = vsel %vm859_vm11, %v854_v27, %v727_v52  ;;  %v822_v57 = vsel %vm808_vm8, %v805_v24, %v656_v40 }
 0x113   : > { %v898_v35 = vunpack.c.l.b16 %v871_v25  ;;  %v839_v32 = vsel %vm825_vm10, %v822_v57, %v680_v0 }
 0x114   : > { %v729_v42 = vpop.permute.xlu2 %728 }
 0x115   : > { %v903_v22 = vpack.c.b16 %v898_v35, %v897_v43 }
 0x117   : > { %1192 = vmatmul.msk.bf16.vlgmr.msra.gmra.mxu2 %vm920_vm12, %v903_v22 }
 0x119   : > { %v705_v36 = vpop.permute.xlu0 %704  ;;  %v707_v44 = vpop.permute.xlu1 %706 }
 0x11a   : > { %v850_v2 = vsel %vm842_vm9, %v833_v17, %v707_v44  ;;  %v848_v51 = vsel %vm842_vm9, %v831_v48, %v705_v36 }
 0x11b   : > { %v867_v49 = vsel %vm859_vm11, %v850_v2, %v723_v38 }
 0x11c   : > { %v896_v5 = vunpack.c.l.b16 %v867_v49 }
 0x121   : > { %v682_v1 = vpop.permute.xlu0 %681  ;;  %v721_v56 = vpop.permute.xlu1 %720 }
 0x122   : > { %v841_v53 = vsel %vm825_vm10, %v824_v30, %v682_v1  ;;  %v865_v33 = vsel %vm859_vm11, %v848_v51, %v721_v56 }
 0x123   : > { %v895_v58 = vunpack.c.l.b16 %v865_v33 }
 0x125   : > { %v902_v16 = vpack.c.b16 %v896_v5, %v895_v58 }
 0x127   : > { %1191 = vmatmul.msk.bf16.vlgmr.msra.gmra.mxu1 %vm920_vm12, %v902_v16 }
 0x129   : > { %v713_v54 = vpop.permute.xlu0 %712  ;;  %v715_v4 = vpop.permute.xlu1 %714 }
 0x12a   : > { %v856_v59 = vsel %vm842_vm9, %v839_v32, %v713_v54  ;;  %v858_v60 = vsel %vm842_vm9, %v841_v53, %v715_v4 }
 0x12b   : > { %v873_v11 = vsel %vm859_vm11, %v856_v59, %v729_v42 }
 0x12c   : > { %v899_v6 = vunpack.c.l.b16 %v873_v11 }
 0x131   : > { %v731_v61 = vpop.permute.xlu0 %730 }
 0x132   : > { %v875_v62 = vsel %vm859_vm11, %v858_v60, %v731_v61 }
 0x133   : > { %v900_v7 = vunpack.c.l.b16 %v875_v62 }
 0x135   : > { %v904_v8 = vpack.c.b16 %v900_v7, %v899_v6 }
 0x137   : > { %1193 = vmatmul.msk.bf16.vlgmr.msra.gmra.mxu3 %vm920_vm12, %v904_v8 }
 0x174   : > { %v946_v46 = vpop.f32.mrf.mxu0 }
 0x175   : > { %v947_v10 = vadd.f32 %v1310_v12, %v946_v46 }
 0x177   : > { %966 = vst [vmem:[%s1938_s14] sm:$0xff] %v947_v10  ;;  %v988_v21 = vmul.f32 %v947_v10, %v947_v10 }
 0x17c   : > { %v948_v13 = vpop.f32.mrf.mxu0 }
 0x17d   : > { %v949_v14 = vadd.f32 %v1310_v12, %v948_v13 }
 0x17f   : > { %967 = vst [vmem:[%s1938_s14 + $0x8] sm:$0xff] %v949_v14  ;;  %v989_v20 = vmul.f32 %v949_v14, %v949_v14  ;;  %v974_v24 = vadd.f32 %v949_v14, %v947_v10 }
 0x181   : > { %v996_v29 = vadd.f32 %v989_v20, %v988_v21 }
 0x19a   : > { %v956_v15 = vpop.f32.mrf.mxu2 }
 0x19b   : > { %v957_v18 = vadd.f32 %v1310_v12, %v956_v15 }
 0x19d   : > { %970 = vst [vmem:[%s1938_s14 + $0x20] sm:$0xff] %v957_v18  ;;  %v992_v27 = vmul.f32 %v957_v18, %v957_v18 }
 0x1a2   : > { %v958_v19 = vpop.f32.mrf.mxu2 }
 0x1a3   : > { %v959_v50 = vadd.f32 %v1310_v12, %v958_v19 }
 0x1a4   : > { %v951_v39 = vpop.f32.mrf.mxu1 }
 0x1a5   : > { %971 = vst [vmem:[%s1938_s14 + $0x28] sm:$0xff] %v959_v50  ;;  %v952_v41 = vadd.f32 %v1310_v12, %v951_v39  ;;  %v993_v25 = vmul.f32 %v959_v50, %v959_v50 }
 0x1a7   : > { %968 = vst [vmem:[%s1938_s14 + $0x10] sm:$0xff] %v952_v41  ;;  %v990_v28 = vmul.f32 %v952_v41, %v952_v41  ;;  %v975_v31 = vadd.f32 %v974_v24, %v952_v41 }
 0x1a9   : > { %v997_v45 = vadd.f32 %v996_v29, %v990_v28 }
 0x1ac   : > { %v953_v63 = vpop.f32.mrf.mxu1 }
 0x1ad   : > { %v954_v30 = vadd.f32 %v1310_v12, %v953_v63 }
 0x1af   : > { %969 = vst [vmem:[%s1938_s14 + $0x18] sm:$0xff] %v954_v30  ;;  %v991_v34 = vmul.f32 %v954_v30, %v954_v30  ;;  %v976_v23 = vadd.f32 %v975_v31, %v954_v30 }
 0x1b1   : > { %v998_v26 = vadd.f32 %v997_v45, %v991_v34  ;;  %v977_v52 = vadd.f32 %v976_v23, %v957_v18 }
 0x1b3   : > { %v999_v40 = vadd.f32 %v998_v26, %v992_v27  ;;  %v978_v57 = vadd.f32 %v977_v52, %v959_v50 }
 0x1b5   : > { %v1000_v22 = vadd.f32 %v999_v40, %v993_v25 }
 0x1ba   : > { %v961_v37 = vpop.f32.mrf.mxu3 }
 0x1bb   : > { %v962_v0 = vadd.f32 %v1310_v12, %v961_v37 }
 0x1bd   : > { %972 = vst [vmem:[%s1938_s14 + $0x30] sm:$0xff] %v962_v0  ;;  %v994_v43 = vmul.f32 %v962_v0, %v962_v0  ;;  %v979_v32 = vadd.f32 %v978_v57, %v962_v0 }
 0x1bf   : > { %v1001_v44 = vadd.f32 %v1000_v22, %v994_v43 }
 0x1c2   : > { %v963_v35 = vpop.f32.mrf.mxu3 }
 0x1c3   : > { %v964_v36 = vadd.f32 %v1310_v12, %v963_v35 }
 0x1c5   : > { %973 = vst [vmem:[%s1938_s14 + $0x38] sm:$0xff] %v964_v36  ;;  %v980_v47 = vadd.f32 %v979_v32, %v964_v36  ;;  %v995_v9 = vmul.f32 %v964_v36, %v964_v36 }
 0x1c6   : > { %1338 = shalt.err (!%p1335_p3)
}
 0x1c7   : > { %s1444_s14 = smov 128   ;;  %v981_v17 = vrot.slane %v980_v47, 4  ;;  %v1002_v2 = vadd.f32 %v1001_v44, %v995_v9  ;;  %s1045_s8 = scalar_lea.hbm %s2037_s4, %s1496_s22 }
 0x1c8   : > { %1251 = dma.vmem_to_hbm [thread:$0]  (%p1515_p5), %s1032_s26, 1024, %s1034_s6, %s1011_s7, %s1444_s14, %s1444_s14, %s1436_s30  }
 0x1c9   : > { %v982_v38 = vadd.f32 %v981_v17, %v980_v47  ;;  %v1003_v3 = vrot.slane %v1002_v2, 4  ;;  %s1015_s9 = sand.u32 1, %s1496_s22   ;;  %s1058_s13 = scalar_lea.hbm %s2038_s5, %s1496_s22 }
 0x1ca   : > { %s227_s15 = scalar_lea.vmem [#allocation4], %s1932_s10  ;;  %s1977_s26 = sshll.u32 %s1045_s8, 4  ;;  %s1050_s26 = int_to_ptr.hbm [resolvable:$true] %s1977_s26 }
 0x1cb   : > { %v983_v55 = vrot.slane %v982_v38, 2  ;;  %v1004_v48 = vadd.f32 %v1003_v3, %v1002_v2  ;;  %s1975_s30 = sshll.u32 %s227_s15, 4  ;;  %s233_s6 = scalar_lea.vmem [#allocation6], %s1932_s10  ;;  %s1048_s30 = int_to_ptr.vmem [resolvable:$true] %s1975_s30 }
 0x1cc   : > { %s1980_s7 = sshll.u32 %s233_s6, 4  ;;  %s1982_s16 = sshll.u32 %s1058_s13, 4  ;;  %s1061_s7 = int_to_ptr.vmem [resolvable:$true] %s1980_s7  ;;  %s1063_s16 = int_to_ptr.hbm [resolvable:$true] %s1982_s16 }
 0x1cd   : > { %v1005_v49 = vrot.slane %v1004_v48, 2  ;;  %v984_v51 = vadd.f32 %v983_v55, %v982_v38  ;;  %s1016_s22 = scalar_lea.sflag [#allocation5], %s1015_s9  ;;  %s1353_s14 = sshra.s32 %s1050_s26, 4  ;;  %s1354_s14 = int_to_ptr.hbm [resolvable:$true] %s1353_s14 }
 0x1ce   : > { %s1355_s17 = scalar_lea.hbm %s1354_s14, 1  ;;  %s1359_s8 = scalar_lea.hbm %s2037_s4, 2 }
 0x1cf   : > { %v985_v1 = vrot.slane %v984_v51, 1  ;;  %v1006_v56 = vadd.f32 %v1005_v49, %v1004_v48  ;;  %p1356_p4 = scmp.ne.s32.totalorder %s1354_s14, %s1355_s17  ;;  %p1360_p9 = scmp.lt.s32.totalorder %s1354_s14, %s2037_s4 }
 0x1d0   : > { %p1361_p10 = scmp.lt.s32.totalorder %s1359_s8, %s1355_s17 }
 0x1d1   : > { %v986_v53 = vadd.f32 %v985_v1, %v984_v51  ;;  %v1007_v33 = vrot.slane %v1006_v56, 1  ;;  %p1357_p7 = pnand %p1356_p4, %p1515_p5 }
 0x1d2   : > { %p1362_p11 = por %p1361_p10, %p1360_p9 }
 0x1d3   : > { %987 = vst [vmem:[%s227_s15] sm:$0x1] %v986_v53  ;;  %v1008_v5 = vadd.f32 %v1007_v33, %v1006_v56  ;;  %p1358_p8 = pneg %p1357_p7 }
 0x1d5   : > { %p1363_p12 = pnand %p1362_p11, %p1358_p8 }
 0x1d7   : > { %1366 = shalt.err (!%p1363_p12)
}
 0x1d8   : > { %1252 = dma.vmem_to_hbm [thread:$0]  (%p1515_p5), %s1048_s30, 16, %s1050_s26, %s1016_s22   ;;  %1009 = vst [vmem:[%s233_s6] sm:$0x1] %v1008_v5 }
 0x1d9   : > { %s1381_s9 = sshra.s32 %s1063_s16, 4  ;;  %s1387_s17 = scalar_lea.hbm %s2038_s5, 2  ;;  %s1382_s9 = int_to_ptr.hbm [resolvable:$true] %s1381_s9 }
 0x1da   : > { %s1383_s13 = scalar_lea.hbm %s1382_s9, 1  ;;  %p1388_p2 = scmp.lt.s32.totalorder %s1382_s9, %s2038_s5 }
 0x1db   : > { %p1384_p13 = scmp.ne.s32.totalorder %s1382_s9, %s1383_s13  ;;  %p1389_p3 = scmp.lt.s32.totalorder %s1387_s17, %s1383_s13 }
 0x1dd   : > { %p1385_p0 = pnand %p1384_p13, %p1515_p5  ;;  %p1390_p4 = por %p1389_p3, %p1388_p2 }
 0x1df   : > { %p1386_p1 = pneg %p1385_p0 }
 0x1e1   : > { %p1391_p7 = pnand %p1390_p4, %p1386_p1 }
 0x1e3   : > { %1394 = shalt.err (!%p1391_p7)
}
 0x1e4   : > { %1253 = dma.vmem_to_hbm [thread:$0]  (%p1515_p5), %s1061_s7, 16, %s1063_s16, %s1016_s22  }
 0x1e5 PF: > { %p1267_p8 = scmp.ge.s32.totalorder %s1433_s21, 2  ;;  %s1074_s30 = sand.u32 1, %s1421_s18  }
 0x1e6   : > { %s1075_s26 = scalar_lea.sflag [#allocation3], %s1074_s30 }
 0x1e7   : > { %p1258_p9 = pnand %p1267_p8, %p1519_p6 }
 0x1e9   : > { %p1259_p10 = pneg %p1258_p9 }
 0x1eb   : > { %1412 = dma.done.wait (%p1259_p10), %s1075_s26, 1024  }
 0x1ec   : > { %1414 = vsyncadd (%p1259_p10), %s1075_s26, 4294966272  ;;  %s1084_s28 = sand.u32 1, %s1175_s23  }
 0x1ed   : > { %s1085_s6 = scalar_lea.sflag [#allocation5], %s1084_s28 }
 0x1ee   : > { %1416 = dma.done.wait (%p1259_p10), %s1085_s6, 32  }
 0x1ef   : > { %1418 = vsyncadd (%p1259_p10), %s1085_s6, 4294967264  ;;  %p19_p5 = scmp.ge.s32.totalorder %s1500_s24, 4   ;;  %s2043_s18 = smov %s1425_s19 }
 0x1f0   : > { %s2044_s19 = smov %s1429_s20  ;;  %s2045_s20 = smov %s1513_s27 }
 0x1f1   : > { %s2046_s21 = smov %s1500_s24  ;;  %21 = sbr.rel (!%p19_p5) target bundleno = 5 (0x5), region = 99 }
 0x1f6   :  { %1099 = vsyncpa [#allocation3], 1 }
 0x1f7   :  { %1101 = vsyncpa [#allocation3 + $0x1], 1 }
 0x1f8   :  { %1102 = vsyncpa [#allocation5], 1 }
 0x1f9   :  { %1104 = vsyncpa [#allocation5 + $0x1], 1 }

</bundles_post_ra>
